<compile_context>
chip_gen: v7x
topology: tpu7x:2x2x1
jax: 0.10.0
libtpu: 0.0.40
codegen_flags: <defaults>
</compile_context>

<pallas_src>
import jax
import jax.numpy as jnp
from jax.experimental import pallas as pl
from jax.experimental.pallas import tpu as pltpu

LANES = 128


def _round_up(v, m):
    return ((v + m - 1) // m) * m


def vfe_forward(voxel_features, voxel_num_points, *,
                max_tile_rows=8192, vmem_budget_bytes=32 * 1024 * 1024):
    """MeanVFE forward.

    voxel_features  : (N, P, C)  zero-padded per-point features
    voxel_num_points: (N,)       valid-point count per voxel
    returns         : (N, C)     mean feature per voxel
    """
    N, P, C = voxel_features.shape
    in_dtype = voxel_features.dtype
    itemsize = jnp.dtype(in_dtype).itemsize
    W = P * C

    # ---- zero-copy layout: (N, P, C) -> (N, P*C); counts -> (N, 1) ----------
    feats2d = voxel_features.reshape(N, W)                    # free reshape
    counts2d = voxel_num_points.reshape(N, 1)                 # tiny, O(N) bytes

    # ---- tile sizing: account for every VMEM buffer (review pt. 4) ----------
    lanes_in = _round_up(W, LANES)       # VMEM lane padding of the input block
    lanes_out = _round_up(C, LANES)
    bytes_per_row = (
        2 * lanes_in * itemsize          # double-buffered input block
        + lanes_in * 4                   # f32 reduction accumulator (worst case)
        + 2 * LANES * 4                  # double-buffered counts block (1 lane, padded)
        + 2 * lanes_out * itemsize       # double-buffered output block
    )
    tile_n = vmem_budget_bytes // bytes_per_row
    tile_n = max(8, min(int(tile_n), max_tile_rows))
    # Keep >= ~4 grid steps when N is large enough so v7x's two TensorCores
    # both get work (v5e/v6e have one TC; a few extra 0.35us steps are noise).
    tile_n = min(tile_n, max(8, _round_up(pl.cdiv(N, 4), 8)))
    tile_n = max(8, (tile_n // 8) * 8)

    grid = (pl.cdiv(N, tile_n),)
    footprint = tile_n * bytes_per_row
    vmem_limit = int(min(40 * 1024 * 1024,                     # v7x-safe ceiling
                         max(footprint * 5 // 4 + (2 << 20), 8 << 20)))

    def kernel(feats_ref, counts_ref, out_ref):
        # feats_ref : (tile_n, P*C)   counts_ref: (tile_n, 1)   out_ref: (tile_n, C)
        x = feats_ref[...]
        # Tree-sum of the P channel-groups along the lane axis.  Lane-offset
        # slices lower to XLU lane shifts (idle slot in this mem-bound kernel);
        # adds run on the VPU.  Cast to f32 happens on the first-level slices
        # so no full-width f32 temp is materialized for sub-32-bit inputs.
        groups = P
        cur = x
        extras = []
        while groups > 1:
            if groups % 2:                                   # peel unpaired last group
                extras.append(cur[:, (groups - 1) * C: groups * C])
                groups -= 1
            half = groups // 2
            lo = cur[:, : half * C]
            hi = cur[:, half * C: groups * C]
            cur = lo.astype(jnp.float32) + hi.astype(jnp.float32)
            groups = half
        summed = cur.astype(jnp.float32)                     # (tile_n, C)
        for e in extras:
            summed = summed + e.astype(jnp.float32)

        # counts: raw int32, broadcast over the C lanes inside the kernel.
        cnt = jnp.maximum(counts_ref[...].astype(jnp.float32), 1.0)   # (tile_n, 1)
        inv = pl.reciprocal(cnt, approx=False)               # EUP slot; <=1 ulp vs divide
        out_ref[...] = (summed * inv).astype(out_ref.dtype)

    out = pl.pallas_call(
        kernel,
        out_shape=jax.ShapeDtypeStruct((N, C), in_dtype),
        grid=grid,
        in_specs=[
            pl.BlockSpec((tile_n, W), lambda i: (i, 0)),     # last dim == full array dim
            pl.BlockSpec((tile_n, 1), lambda i: (i, 0)),
        ],
        out_specs=pl.BlockSpec((tile_n, C), lambda i: (i, 0)),
        compiler_params=pltpu.CompilerParams(
            dimension_semantics=("parallel",),
            vmem_limit_bytes=vmem_limit,
        ),
        cost_estimate=pl.CostEstimate(
            flops=N * (P - 1) * C + 2 * N * C,
            transcendentals=N,
            bytes_accessed=N * W * itemsize + N * 4 + N * C * itemsize,
        ),
    )(feats2d, counts2d)
    return out


if __name__ == "__main__":
    key = jax.random.PRNGKey(0)
    k_feat, k_cnt = jax.random.split(key)

    num_voxels, max_points, C = 64, 8, 4   # small shapes consistent with a VFE input

    # Raw per-point features (x, y, z, intensity)-like.
    raw = jax.random.normal(k_feat, (num_voxels, max_points, C), dtype=jnp.float32)
    # Valid-point counts in [1, max_points].
    num_points = jax.random.randint(
        k_cnt, (num_voxels,), 1, max_points + 1, dtype=jnp.int32)
    # Zero-pad invalid point slots (standard voxelization output convention).
    point_idx = jnp.arange(max_points)[None, :, None]        # (1, P, 1)
    valid = point_idx < num_points[:, None, None]            # (N, P, 1)
    voxel_features = jnp.where(valid, raw, 0.0)

    vfe_features = jax.block_until_ready(vfe_forward(voxel_features, num_points))

    # Pure-JAX reference check.
    ref = jnp.sum(voxel_features, axis=1) / jnp.maximum(
        num_points.astype(jnp.float32), 1.0)[:, None]
    assert vfe_features.shape == (num_voxels, C)
    assert jnp.allclose(vfe_features, ref, atol=1e-5, rtol=1e-5)

    print("KERNEL_OK")
</pallas_src>

<mosaic_0001>
module attributes {stable_mosaic.version = 11 : i64} {
  func.func @kernel(%arg0: i32, %arg1: memref<16x32xf32, #tpu.memory_space<vmem>>, %arg2: memref<16x1xi32, #tpu.memory_space<vmem>>, %arg3: memref<16x4xf32, #tpu.memory_space<vmem>>) attributes {dimension_semantics = [#tpu.dimension_semantics<parallel>], iteration_bounds = array<i64: 4>, scalar_prefetch = 0 : i64, scratch_operands = 0 : i64, tpu.core_type = #tpu.core_type<tc>, window_params = [{transform_indices = @transform_0, window_bounds = array<i64: 16, 32>}, {transform_indices = @transform_1, window_bounds = array<i64: 16, 1>}, {transform_indices = @transform_2, window_bounds = array<i64: 16, 4>}]} {
    %c0 = arith.constant 0 : index
    %c0_0 = arith.constant 0 : index
    %0 = vector.load %arg1[%c0, %c0_0] : memref<16x32xf32, #tpu.memory_space<vmem>>, vector<16x32xf32>
    %1 = vector.extract_strided_slice %0 {offsets = [0, 0], sizes = [16, 16], strides = [1, 1]} : vector<16x32xf32> to vector<16x16xf32>
    %2 = vector.extract_strided_slice %0 {offsets = [0, 16], sizes = [16, 16], strides = [1, 1]} : vector<16x32xf32> to vector<16x16xf32>
    %3 = arith.addf %1, %2 : vector<16x16xf32>
    %4 = vector.extract_strided_slice %3 {offsets = [0, 0], sizes = [16, 8], strides = [1, 1]} : vector<16x16xf32> to vector<16x8xf32>
    %5 = vector.extract_strided_slice %3 {offsets = [0, 8], sizes = [16, 8], strides = [1, 1]} : vector<16x16xf32> to vector<16x8xf32>
    %6 = arith.addf %4, %5 : vector<16x8xf32>
    %7 = vector.extract_strided_slice %6 {offsets = [0, 0], sizes = [16, 4], strides = [1, 1]} : vector<16x8xf32> to vector<16x4xf32>
    %8 = vector.extract_strided_slice %6 {offsets = [0, 4], sizes = [16, 4], strides = [1, 1]} : vector<16x8xf32> to vector<16x4xf32>
    %9 = arith.addf %7, %8 : vector<16x4xf32>
    %c0_1 = arith.constant 0 : index
    %c0_2 = arith.constant 0 : index
    %10 = vector.load %arg2[%c0_1, %c0_2] : memref<16x1xi32, #tpu.memory_space<vmem>>, vector<16x1xi32>
    %11 = arith.sitofp %10 : vector<16x1xi32> to vector<16x1xf32>
    %cst = arith.constant 1.000000e+00 : f32
    %12 = vector.broadcast %cst : f32 to vector<16x1xf32>
    %13 = arith.maximumf %11, %12 : vector<16x1xf32>
    %14 = tpu.reciprocal %13 : vector<16x1xf32> -> vector<16x1xf32>
    %15 = vector.broadcast %14 : vector<16x1xf32> to vector<16x4xf32>
    %16 = arith.mulf %9, %15 : vector<16x4xf32>
    %c0_3 = arith.constant 0 : index
    %c0_4 = arith.constant 0 : index
    %17 = vector.load %arg3[%c0_3, %c0_4] : memref<16x4xf32, #tpu.memory_space<vmem>>, vector<16x4xf32>
    tpu.vector_store %arg3[%c0_3, %c0_4], %16 {strides = array<i32>} : memref<16x4xf32, #tpu.memory_space<vmem>>, vector<16x4xf32>,
    return
  }
  func.func @transform_0(%arg0: i32) -> (i32, i32) {
    %c0_i32 = arith.constant 0 : i32
    %c0_i32_0 = arith.constant 0 : i32
    return %arg0, %c0_i32 : i32, i32
  }
  func.func @transform_1(%arg0: i32) -> (i32, i32) {
    %c0_i32 = arith.constant 0 : i32
    %c0_i32_0 = arith.constant 0 : i32
    return %arg0, %c0_i32 : i32, i32
  }
  func.func @transform_2(%arg0: i32) -> (i32, i32) {
    %c0_i32 = arith.constant 0 : i32
    %c0_i32_0 = arith.constant 0 : i32
    return %arg0, %c0_i32 : i32, i32
  }
}

</mosaic_0001>

<bundles_post_ra>
// kernel: tpu_custom_call.1
= control target key start
LH: loop header
LB: loop body
LE: loop exit
PB: predicated region body
PF: predicated region fallthrough
CT: control target
= control target key end

     0   :  { %s350_s9 = smov 0   ;;  %s375_s0 = inlined_call_operand.vmem [shape: f32[64,32], index: 0, kind: input, shape index: {}]   ;;  %s376_s1 = inlined_call_operand.vmem [shape: s32[64,1], index: 1, kind: input, shape index: {}]   ;;  %s377_s2 = inlined_call_operand.vmem [shape: f32[64,4], index: 2, kind: output, shape index: {}]  }
   0x1 LB: > { %s292_s10 = sadd.s32 4294967295, %s329_s9   ;;  %p296_p0 = scmp.ge.s32.totalorder %s329_s9, 1  ;;  %s329_s9 = sphi %s350_s9, %s12_s9  }
   0x2   : > { %p124_p1 = scmp.lt.s32.totalorder %s329_s9, 5 }
   0x4   : > { %p125_p2 = pnand %p296_p0, %p124_p1 }
   0x5   : > { %s297_s11 = sshll.u32 (!%p125_p2), %s292_s10, 1  ;;  %v331_v0 = vmov (!%p125_p2), 0   ;;  %s332_s19 = smov (!%p125_p2), 112   ;;  %vm221_vm0 = vcmask (!%p125_p2), 31744  }
   0x6   : > { %128 = sbr.rel (%p125_p2) target bundleno = 375 (0x177), region = 28  ;;  %p152_p3 = scmp.lt.s32.totalorder (!%p125_p2), %s297_s11, 7  ;;  %318 = vset.pattern.permute.xlu1 (!%p125_p2), %v331_v0  ;;  %317 = vset.pattern.permute.xlu0 (!%p125_p2), %v331_v0 }
   0x7   : > { %s333_s20 = smov (!%p125_p2), 120   ;;  %s334_s21 = smov (!%p125_p2), 124  }
   0xd   : > { %s379_s11 = smov (!%p152_p3, %s297_s11), 7 }
   0xe   : > { %s358_s12 = sshll.u32 %s379_s11, 3 }
   0xf   : > { %s155_s15 = scalar_lea.vmem %s375_s0, %s358_s12  ;;  %s161_s18 = scalar_lea.vmem %s376_s1, %s358_s12 }
  0x10   : > { %v169_v1 = vld [vmem:[%s155_s15] sm:$0xff]  ;;  %v170_v4 = vld [vmem:[%s155_s15 + $0x8] sm:$0xff]  ;;  %s167_s24 = scalar_lea.vmem %s377_s2, %s358_s12 }
  0x11   : > { %v201_v2 = vld [vmem:[%s161_s18] sm:$0xff]  ;;  %173 = vrot.lane.b32.xlu0 %v169_v1, %s332_s19  ;;  %v202_v7 = vld [vmem:[%s161_s18 + $0x8] sm:$0xff] }
  0x12   : > { %v203_v3 = vcvt.s32.f32 %v201_v2  ;;  %v204_v8 = vcvt.s32.f32 %v202_v7 }
  0x14   : > { %v205_v5 = vmax.f32 %v203_v3, 1.0  ;;  %v206_v9 = vmax.f32 %v204_v8, 1.0 }
  0x15   : > { %175 = vrot.lane.b32.xlu0 %v170_v4, %s332_s19 }
  0x16   : > { %319 = vrcp.f32 %v205_v5 }
  0x17   : > { %321 = vrcp.f32 %v206_v9 }
  0x20   : > { %v320_v6 = vpop.eup %319 }
  0x21   : > { %211 = vperm.xlu0 %317, %v320_v6   ;;  %v322_v14 = vpop.eup %321 }
  0x83   : > { %v174_v10 = vpop.permute.xlu0 %173 }
  0x84   : > { %v179_v11 = vadd.f32 %v174_v10, %v169_v1 }
  0x86   : > { %183 = vrot.lane.b32.xlu1 %v179_v11, %s333_s20 }
  0x87   : > { %v176_v12 = vpop.permute.xlu0 %175 }
  0x88   : > { %v180_v13 = vadd.f32 %v176_v12, %v170_v4 }
  0x8a   : > { %185 = vrot.lane.b32.xlu1 %v180_v13, %s333_s20 }
  0x8e   : > { %216 = vperm.xlu1 %318, %v322_v14  }
  0xa0   : > { %v212_v20 = vpop.permute.xlu0 %211 }
  0xf8   : > { %v184_v15 = vpop.permute.xlu1 %183 }
  0xf9   : > { %v189_v16 = vadd.f32 %v184_v15, %v179_v11 }
  0xfb   : > { %193 = vrot.lane.b32.xlu1 %v189_v16, %s334_s21 }
  0xfc   : > { %v186_v17 = vpop.permute.xlu1 %185 }
  0xfd   : > { %v190_v18 = vadd.f32 %v186_v17, %v180_v13 }
  0xff   : > { %195 = vrot.lane.b32.xlu0 %v190_v18, %s334_s21 }
 0x10d   : > { %v217_v19 = vpop.permute.xlu1 %216 }
 0x16d   : > { %v194_v21 = vpop.permute.xlu1 %193 }
 0x16e   : > { %v199_v22 = vadd.f32 %v194_v21, %v189_v16 }
 0x170   : > { %v219_v23 = vmul.f32 %v212_v20, %v199_v22 }
 0x171   : > { %v196_v24 = vpop.permute.xlu0 %195 }
 0x172   : > { %222 = vst.msk [vmem:[%s167_s24] sm:$0xff] %vm221_vm0, %v219_v23  ;;  %v200_v25 = vadd.f32 %v196_v24, %v190_v18 }
 0x174   : > { %v220_v26 = vmul.f32 %v217_v19, %v200_v25 }
 0x176   : > { %223 = vst.msk [vmem:[%s167_s24 + $0x8] sm:$0xff] %vm221_vm0, %v220_v26 }
 0x177 PF: > { %s12_s9 = sadd.s32 1, %s329_s9  }
 0x178   : > { %p9_p4 = scmp.ge.s32.totalorder %s12_s9, 6  }
 0x17a   :  { %11 = sbr.rel (!%p9_p4) target bundleno = 1 (0x1), region = 61 }

</bundles_post_ra>
